<compile_context>
chip_gen: v7x
topology: tpu7x:2x2x1
jax: 0.10.0
libtpu: 0.0.40
codegen_flags: <defaults>
</compile_context>

<pallas_src>
import jax
import jax.numpy as jnp
from jax.experimental import pallas as pl
from jax.experimental.pallas import tpu as pltpu

BN_EPS = 1e-5
LANE = 128          # lane width / padded class dimension
NEG_BIG = -1e30     # bias for padded (fake) classes


def _bot_kernel(x_ref, w1_ref, b1_ref, w2_ref, b2_ref, w3_ref, b3_ref, o_ref):
    x = x_ref[...]            # (TB, 4)  f32
    w1 = w1_ref[...]          # (4, 128) f32, BN-folded

    # fc1 (K=4): 4 broadcast FMAs on the VPU — avoids a near-empty MXU contraction.
    h = (x[:, 0:1] * w1[0:1, :] + x[:, 1:2] * w1[1:2, :]
         + x[:, 2:3] * w1[2:3, :] + x[:, 3:4] * w1[3:4, :] + b1_ref[...])
    h = jnp.maximum(h, 0.0)   # relu; dropout = identity in eval

    # fc2 (128x128) on the MXU: bf16 operands, f32 accumulate, BN folded into w2/b2.
    h = jnp.dot(h.astype(jnp.bfloat16), w2_ref[...],
                preferred_element_type=jnp.float32) + b2_ref[...]
    h = jnp.maximum(h, 0.0)

    # fc3 padded to 128 lanes -> lane-dense log_softmax reductions.
    logits = jnp.dot(h.astype(jnp.bfloat16), w3_ref[...],
                     preferred_element_type=jnp.float32) + b3_ref[...]
    mx = jnp.max(logits, axis=-1, keepdims=True)
    z = logits - mx
    lse = jnp.log(jnp.sum(jnp.exp(z), axis=-1, keepdims=True))
    out = z - lse
    o_ref[...] = out[:, :o_ref.shape[-1]].astype(o_ref.dtype)  # store the 9 real lanes


def fold_params(p):
    """One-time constant fold of eval-mode BatchNorm into the linear layers,
    bf16 cast of the MXU weight operands, and lane-padding of fc3 to 128 classes."""
    s1 = p["g1"] * jax.lax.rsqrt(p["v1"] + BN_EPS)                 # (1, 128)
    w1 = (p["w1"] * s1).astype(jnp.float32)                        # (4, 128), f32 (VPU path)
    b1 = ((p["b1"] - p["m1"]) * s1 + p["be1"]).astype(jnp.float32)

    s2 = p["g2"] * jax.lax.rsqrt(p["v2"] + BN_EPS)
    w2 = (p["w2"] * s2).astype(jnp.bfloat16)                       # (128, 128) bf16 for MXU
    b2 = ((p["b2"] - p["m2"]) * s2 + p["be2"]).astype(jnp.float32)

    n_classes = p["w3"].shape[1]
    pad = LANE - n_classes
    w3 = jnp.pad(p["w3"], ((0, 0), (0, pad))).astype(jnp.bfloat16)            # (128, 128)
    b3 = jnp.concatenate(
        [p["b3"].astype(jnp.float32), jnp.full((1, pad), NEG_BIG, jnp.float32)], axis=1)

    return dict(w1=w1, b1=b1, w2=w2, b2=b2, w3=w3, b3=b3, n_classes=n_classes)


def classification_bot_forward(x, fp, *, tb=1024):
    """x: (B, 4) f32, fp: fold_params(...) output. Returns (B, 9) log-probs."""
    B, F = x.shape
    n_classes = fp["n_classes"]

    # Batch tile: multiple of 8 sublanes, capped so small batches use a single block.
    tb = min(tb, max(8, ((B + 7) // 8) * 8))
    grid = (pl.cdiv(B, tb),)

    resident = lambda a: pl.BlockSpec(a.shape, lambda i: (0,) * a.ndim)  # stays in VMEM
    in_specs = [
        pl.BlockSpec((tb, F), lambda i: (i, 0)),   # x: tiled over batch
        resident(fp["w1"]), resident(fp["b1"]),
        resident(fp["w2"]), resident(fp["b2"]),
        resident(fp["w3"]), resident(fp["b3"]),
    ]
    out_specs = pl.BlockSpec((tb, n_classes), lambda i: (i, 0))

    return pl.pallas_call(
        _bot_kernel,
        out_shape=jax.ShapeDtypeStruct((B, n_classes), jnp.float32),
        grid=grid,
        in_specs=in_specs,
        out_specs=out_specs,
        compiler_params=pltpu.CompilerParams(dimension_semantics=("parallel",)),
    )(x, fp["w1"], fp["b1"], fp["w2"], fp["b2"], fp["w3"], fp["b3"])


def init_params(key):
    """Deterministic init mimicking nn.Linear (uniform +-1/sqrt(fan_in)) and
    nn.BatchNorm1d defaults (gamma=1, beta=0, running_mean=0, running_var=1).
    Linear weights stored as (in, out)."""
    ks = jax.random.split(key, 6)

    def linear(kw, kb, fan_in, fan_out):
        bound = 1.0 / jnp.sqrt(jnp.float32(fan_in))
        w = jax.random.uniform(kw, (fan_in, fan_out), jnp.float32, -bound, bound)
        b = jax.random.uniform(kb, (1, fan_out), jnp.float32, -bound, bound)
        return w, b

    w1, b1 = linear(ks[0], ks[1], 4, 128)
    w2, b2 = linear(ks[2], ks[3], 128, 128)
    w3, b3 = linear(ks[4], ks[5], 128, 9)

    def bn(n):
        return (jnp.ones((1, n), jnp.float32),   # gamma
                jnp.zeros((1, n), jnp.float32),  # beta
                jnp.zeros((1, n), jnp.float32),  # running_mean
                jnp.ones((1, n), jnp.float32))   # running_var

    g1, be1, m1, v1 = bn(128)
    g2, be2, m2, v2 = bn(128)

    return dict(w1=w1, b1=b1, g1=g1, be1=be1, m1=m1, v1=v1,
                w2=w2, b2=b2, g2=g2, be2=be2, m2=m2, v2=v2,
                w3=w3, b3=b3)


def _reference(x, p):
    """Pure-JAX f32 eval-mode reference of the original module (unfolded BN)."""
    h = x @ p["w1"] + p["b1"]
    h = (h - p["m1"]) * jax.lax.rsqrt(p["v1"] + BN_EPS) * p["g1"] + p["be1"]
    h = jnp.maximum(h, 0.0)
    h = h @ p["w2"] + p["b2"]
    h = (h - p["m2"]) * jax.lax.rsqrt(p["v2"] + BN_EPS) * p["g2"] + p["be2"]
    h = jnp.maximum(h, 0.0)
    logits = h @ p["w3"] + p["b3"]
    return jax.nn.log_softmax(logits, axis=1)


if __name__ == "__main__":
    key = jax.random.PRNGKey(0)
    kx, kp = jax.random.split(key)

    batch = 24
    x = jax.random.normal(kx, (batch, 4), jnp.float32)
    params = init_params(kp)
    folded = fold_params(params)   # one-time BN fold / bf16 cast / class padding

    # Small tb so the test exercises a multi-step grid with resident weights.
    out = classification_bot_forward(x, folded, tb=8)
    out = jax.block_until_ready(out)

    ref = _reference(x, params)
    assert out.shape == (batch, 9)
    # bf16 MXU operands => looser tolerance than pure-f32; structure is exact.
    assert jnp.allclose(out, ref, atol=2e-2, rtol=2e-2), "mismatch vs reference"

    print("KERNEL_OK")
</pallas_src>

<mosaic_0001>
module attributes {stable_mosaic.version = 11 : i64} {
  func.func @_bot_kernel(%arg0: i32, %arg1: memref<8x4xf32, #tpu.memory_space<vmem>>, %arg2: memref<4x128xf32, #tpu.memory_space<vmem>>, %arg3: memref<1x128xf32, #tpu.memory_space<vmem>>, %arg4: memref<128x128xbf16, #tpu.memory_space<vmem>>, %arg5: memref<1x128xf32, #tpu.memory_space<vmem>>, %arg6: memref<128x128xbf16, #tpu.memory_space<vmem>>, %arg7: memref<1x128xf32, #tpu.memory_space<vmem>>, %arg8: memref<8x9xf32, #tpu.memory_space<vmem>>) attributes {dimension_semantics = [#tpu.dimension_semantics<parallel>], iteration_bounds = array<i64: 3>, scalar_prefetch = 0 : i64, scratch_operands = 0 : i64, tpu.core_type = #tpu.core_type<tc>, window_params = [{transform_indices = @transform_0, window_bounds = array<i64: 8, 4>}, {pipeline_mode = #tpu.pipeline_mode<synchronous>, transform_indices = @transform_1, window_bounds = array<i64: 4, 128>}, {pipeline_mode = #tpu.pipeline_mode<synchronous>, transform_indices = @transform_2, window_bounds = array<i64: 1, 128>}, {pipeline_mode = #tpu.pipeline_mode<synchronous>, transform_indices = @transform_3, window_bounds = array<i64: 128, 128>}, {pipeline_mode = #tpu.pipeline_mode<synchronous>, transform_indices = @transform_4, window_bounds = array<i64: 1, 128>}, {pipeline_mode = #tpu.pipeline_mode<synchronous>, transform_indices = @transform_5, window_bounds = array<i64: 128, 128>}, {pipeline_mode = #tpu.pipeline_mode<synchronous>, transform_indices = @transform_6, window_bounds = array<i64: 1, 128>}, {transform_indices = @transform_7, window_bounds = array<i64: 8, 9>}]} {
    %c0 = arith.constant 0 : index
    %c0_0 = arith.constant 0 : index
    %0 = vector.load %arg1[%c0, %c0_0] : memref<8x4xf32, #tpu.memory_space<vmem>>, vector<8x4xf32>
    %c0_1 = arith.constant 0 : index
    %c0_2 = arith.constant 0 : index
    %1 = vector.load %arg2[%c0_1, %c0_2] : memref<4x128xf32, #tpu.memory_space<vmem>>, vector<4x128xf32>
    %2 = vector.extract_strided_slice %0 {offsets = [0, 0], sizes = [8, 1], strides = [1, 1]} : vector<8x4xf32> to vector<8x1xf32>
    %3 = vector.extract_strided_slice %1 {offsets = [0, 0], sizes = [1, 128], strides = [1, 1]} : vector<4x128xf32> to vector<1x128xf32>
    %4 = vector.broadcast %2 : vector<8x1xf32> to vector<8x128xf32>
    %5 = vector.broadcast %3 : vector<1x128xf32> to vector<8x128xf32>
    %6 = arith.mulf %4, %5 : vector<8x128xf32>
    %7 = vector.extract_strided_slice %0 {offsets = [0, 1], sizes = [8, 1], strides = [1, 1]} : vector<8x4xf32> to vector<8x1xf32>
    %8 = vector.extract_strided_slice %1 {offsets = [1, 0], sizes = [1, 128], strides = [1, 1]} : vector<4x128xf32> to vector<1x128xf32>
    %9 = vector.broadcast %7 : vector<8x1xf32> to vector<8x128xf32>
    %10 = vector.broadcast %8 : vector<1x128xf32> to vector<8x128xf32>
    %11 = arith.mulf %9, %10 : vector<8x128xf32>
    %12 = arith.addf %6, %11 : vector<8x128xf32>
    %13 = vector.extract_strided_slice %0 {offsets = [0, 2], sizes = [8, 1], strides = [1, 1]} : vector<8x4xf32> to vector<8x1xf32>
    %14 = vector.extract_strided_slice %1 {offsets = [2, 0], sizes = [1, 128], strides = [1, 1]} : vector<4x128xf32> to vector<1x128xf32>
    %15 = vector.broadcast %13 : vector<8x1xf32> to vector<8x128xf32>
    %16 = vector.broadcast %14 : vector<1x128xf32> to vector<8x128xf32>
    %17 = arith.mulf %15, %16 : vector<8x128xf32>
    %18 = arith.addf %12, %17 : vector<8x128xf32>
    %19 = vector.extract_strided_slice %0 {offsets = [0, 3], sizes = [8, 1], strides = [1, 1]} : vector<8x4xf32> to vector<8x1xf32>
    %20 = vector.extract_strided_slice %1 {offsets = [3, 0], sizes = [1, 128], strides = [1, 1]} : vector<4x128xf32> to vector<1x128xf32>
    %21 = vector.broadcast %19 : vector<8x1xf32> to vector<8x128xf32>
    %22 = vector.broadcast %20 : vector<1x128xf32> to vector<8x128xf32>
    %23 = arith.mulf %21, %22 : vector<8x128xf32>
    %24 = arith.addf %18, %23 : vector<8x128xf32>
    %c0_3 = arith.constant 0 : index
    %c0_4 = arith.constant 0 : index
    %25 = vector.load %arg3[%c0_3, %c0_4] : memref<1x128xf32, #tpu.memory_space<vmem>>, vector<1x128xf32>
    %26 = vector.broadcast %25 : vector<1x128xf32> to vector<8x128xf32>
    %27 = arith.addf %24, %26 : vector<8x128xf32>
    %cst = arith.constant 0.000000e+00 : f32
    %28 = vector.broadcast %cst : f32 to vector<8x128xf32>
    %29 = arith.maximumf %27, %28 : vector<8x128xf32>
    %30 = arith.truncf %29 : vector<8x128xf32> to vector<8x128xbf16>
    %c0_5 = arith.constant 0 : index
    %c0_6 = arith.constant 0 : index
    %31 = vector.load %arg4[%c0_5, %c0_6] : memref<128x128xbf16, #tpu.memory_space<vmem>>, vector<128x128xbf16>
    %cst_7 = arith.constant dense<0.000000e+00> : vector<8x128xf32>
    %32 = tpu.matmul %30, %31, %cst_7 {dimension_numbers = #tpu.dot_dimension_numbers<[1], [0], [0], [1], [0, 0, 1, 1], [], []>} : vector<8x128xbf16>, vector<128x128xbf16>, vector<8x128xf32> -> vector<8x128xf32>
    %c0_8 = arith.constant 0 : index
    %c0_9 = arith.constant 0 : index
    %33 = vector.load %arg5[%c0_8, %c0_9] : memref<1x128xf32, #tpu.memory_space<vmem>>, vector<1x128xf32>
    %34 = vector.broadcast %33 : vector<1x128xf32> to vector<8x128xf32>
    %35 = arith.addf %32, %34 : vector<8x128xf32>
    %cst_10 = arith.constant 0.000000e+00 : f32
    %36 = vector.broadcast %cst_10 : f32 to vector<8x128xf32>
    %37 = arith.maximumf %35, %36 : vector<8x128xf32>
    %38 = arith.truncf %37 : vector<8x128xf32> to vector<8x128xbf16>
    %c0_11 = arith.constant 0 : index
    %c0_12 = arith.constant 0 : index
    %39 = vector.load %arg6[%c0_11, %c0_12] : memref<128x128xbf16, #tpu.memory_space<vmem>>, vector<128x128xbf16>
    %cst_13 = arith.constant dense<0.000000e+00> : vector<8x128xf32>
    %40 = tpu.matmul %38, %39, %cst_13 {dimension_numbers = #tpu.dot_dimension_numbers<[1], [0], [0], [1], [0, 0, 1, 1], [], []>} : vector<8x128xbf16>, vector<128x128xbf16>, vector<8x128xf32> -> vector<8x128xf32>
    %c0_14 = arith.constant 0 : index
    %c0_15 = arith.constant 0 : index
    %41 = vector.load %arg7[%c0_14, %c0_15] : memref<1x128xf32, #tpu.memory_space<vmem>>, vector<1x128xf32>
    %42 = vector.broadcast %41 : vector<1x128xf32> to vector<8x128xf32>
    %43 = arith.addf %40, %42 : vector<8x128xf32>
    %cst_16 = arith.constant dense<0xFF800000> : vector<8xf32>
    %44 = vector.multi_reduction <maximumf>, %43, %cst_16 [1] : vector<8x128xf32> to vector<8xf32>
    %45 = vector.shape_cast %44 : vector<8xf32> to vector<8x1xf32>
    %46 = vector.broadcast %45 : vector<8x1xf32> to vector<8x128xf32>
    %47 = arith.subf %43, %46 : vector<8x128xf32>
    %48 = math.exp %47 : vector<8x128xf32>
    %cst_17 = arith.constant dense<0.000000e+00> : vector<8xf32>
    %49 = vector.multi_reduction <add>, %48, %cst_17 [1] : vector<8x128xf32> to vector<8xf32>
    %50 = vector.shape_cast %49 : vector<8xf32> to vector<8x1xf32>
    %51 = math.log %50 : vector<8x1xf32>
    %52 = vector.broadcast %51 : vector<8x1xf32> to vector<8x128xf32>
    %53 = arith.subf %47, %52 : vector<8x128xf32>
    %54 = vector.extract_strided_slice %53 {offsets = [0, 0], sizes = [8, 9], strides = [1, 1]} : vector<8x128xf32> to vector<8x9xf32>
    %c0_18 = arith.constant 0 : index
    %c0_19 = arith.constant 0 : index
    %55 = vector.load %arg8[%c0_18, %c0_19] : memref<8x9xf32, #tpu.memory_space<vmem>>, vector<8x9xf32>
    tpu.vector_store %arg8[%c0_18, %c0_19], %54 {strides = array<i32>} : memref<8x9xf32, #tpu.memory_space<vmem>>, vector<8x9xf32>,
    return
  }
  func.func @transform_0(%arg0: i32) -> (i32, i32) {
    %c0_i32 = arith.constant 0 : i32
    %c0_i32_0 = arith.constant 0 : i32
    return %arg0, %c0_i32 : i32, i32
  }
  func.func @transform_1(%arg0: i32) -> (i32, i32) {
    %c0_i32 = arith.constant 0 : i32
    %c0_i32_0 = arith.constant 0 : i32
    %c0_i32_1 = arith.constant 0 : i32
    return %c0_i32, %c0_i32_0 : i32, i32
  }
  func.func @transform_2(%arg0: i32) -> (i32, i32) {
    %c0_i32 = arith.constant 0 : i32
    %c0_i32_0 = arith.constant 0 : i32
    %c0_i32_1 = arith.constant 0 : i32
    return %c0_i32, %c0_i32_0 : i32, i32
  }
  func.func @transform_3(%arg0: i32) -> (i32, i32) {
    %c0_i32 = arith.constant 0 : i32
    %c0_i32_0 = arith.constant 0 : i32
    %c0_i32_1 = arith.constant 0 : i32
    return %c0_i32, %c0_i32_0 : i32, i32
  }
  func.func @transform_4(%arg0: i32) -> (i32, i32) {
    %c0_i32 = arith.constant 0 : i32
    %c0_i32_0 = arith.constant 0 : i32
    %c0_i32_1 = arith.constant 0 : i32
    return %c0_i32, %c0_i32_0 : i32, i32
  }
  func.func @transform_5(%arg0: i32) -> (i32, i32) {
    %c0_i32 = arith.constant 0 : i32
    %c0_i32_0 = arith.constant 0 : i32
    %c0_i32_1 = arith.constant 0 : i32
    return %c0_i32, %c0_i32_0 : i32, i32
  }
  func.func @transform_6(%arg0: i32) -> (i32, i32) {
    %c0_i32 = arith.constant 0 : i32
    %c0_i32_0 = arith.constant 0 : i32
    %c0_i32_1 = arith.constant 0 : i32
    return %c0_i32, %c0_i32_0 : i32, i32
  }
  func.func @transform_7(%arg0: i32) -> (i32, i32) {
    %c0_i32 = arith.constant 0 : i32
    %c0_i32_0 = arith.constant 0 : i32
    return %arg0, %c0_i32 : i32, i32
  }
}

</mosaic_0001>

<bundles_post_ra>
// kernel: tpu_custom_call.1
= control target key start
LH: loop header
LB: loop body
LE: loop exit
PB: predicated region body
PF: predicated region fallthrough
CT: control target
= control target key end

     0   :  { %12 = vsyncpa [#allocation3], 0  ;;  %s1072_s0 = inlined_call_operand.vmem [shape: f32[24,4], index: 0, kind: input, shape index: {}]   ;;  %s1073_s1 = inlined_call_operand.vmem [shape: f32[4,128], index: 1, kind: input, shape index: {}]   ;;  %s1074_s2 = inlined_call_operand.vmem [shape: f32[1,128], index: 2, kind: input, shape index: {}]   ;;  %s1075_s3 = inlined_call_operand.hbm [shape: bf16[128,128], index: 3, kind: input, shape index: {}]   ;;  %s1076_s4 = inlined_call_operand.vmem [shape: f32[1,128], index: 4, kind: input, shape index: {}]   ;;  %s1077_s5 = inlined_call_operand.hbm [shape: bf16[128,128], index: 5, kind: input, shape index: {}]   ;;  %s1078_s6 = inlined_call_operand.vmem [shape: f32[1,128], index: 6, kind: input, shape index: {}]   ;;  %s1079_s7 = inlined_call_operand.vmem [shape: f32[24,9], index: 7, kind: output, shape index: {}]  }
   0x1   :  { %13 = vsyncpa [#allocation5], 0  ;;  %s942_s24 = smov 0  }
   0x2 LB: > { %s948_s25 = sadd.s32 4294967295, %s890_s24   ;;  %p670_p0 = scmp.ge.s32.totalorder %s890_s24, 1  ;;  %s890_s24 = sphi %s942_s24, %s19_s24  }
   0x3   : > { %p202_p1 = scmp.lt.s32.totalorder %s890_s24, 4  ;;  %s892_s26 = smov [#allocation2]  }
   0x4   : > { %s220_s27 = sshll.u32 %s892_s26, 4  ;;  %p1080_p3 = scmp.eq.s32.totalorder %s948_s25, 0  ;;  %s221_s27 = int_to_ptr.vmem [resolvable:$true] %s220_s27 }
   0x5   : > { %p952_p2 = pnand %p670_p0, %p202_p1  ;;  %s893_s29 = smov [#allocation4]  }
   0x6   : > { %s236_s30 = sshll.u32 %s893_s29, 4  ;;  %s820_s11 = scalar_lea.hbm %s1075_s3, 1024  ;;  %s965_s30 = int_to_ptr.vmem [resolvable:$true] %s236_s30 }
   0x7   : > { %s1082_s28 = scalar_select %p952_p2, 1, 0 }
   0x8   : > { %p766_p4 = pneg %p952_p2  ;;  %p821_p6 = scmp.ne.s32.totalorder %s1075_s3, %s820_s11 }
   0x9   : > { %p827_p10 = scmp.lt.u32.totalorder %s820_s11, %s1075_s3 }
   0xa   : > { %p961_p5 = pnand %p1080_p3, %p766_p4 }
   0xc   : > { %p822_p7 = pneg %p961_p5 }
   0xe   : > { %p823_p8 = pnand %p822_p7, %p821_p6 }
  0x10   : > { %p824_p9 = pneg %p823_p8 }
  0x12   : > { %p829_p11 = pnand %p827_p10, %p824_p9 }
  0x14   : > { %832 = shalt.err (!%p829_p11)
}
  0x15   : > { %s833_s16 = scalar_lea.vmem %s221_s27, 1024  ;;  %p841_p1 = scmp.lt.s32.totalorder %s221_s27, %s221_s27 }
  0x16   : > { %p834_p12 = scmp.ne.s32.totalorder %s221_s27, %s833_s16  ;;  %p842_p4 = scmp.lt.s32.totalorder %s833_s16, %s833_s16 }
  0x18   : > { %p836_p13 = pnand %p834_p12, %p822_p7  ;;  %p843_p3 = por %p842_p4, %p841_p1 }
  0x1a   : > { %p837_p0 = pneg %p836_p13 }
  0x1c   : > { %p844_p2 = pnand %p843_p3, %p837_p0 }
  0x1e   : > { %847 = shalt.err (!%p844_p2)
}
  0x1f   : > { %s894_s17 = smov 64   ;;  %s895_s18 = smov 4  }
  0x20   : > { %769 = dma.hbm_to_vmem [thread:$0]  (!%p961_p5), %s1075_s3, 1024, %s221_s27, [#allocation3], %s894_s17, %s894_s17, %s895_s18  }
  0x21   : > { %s848_s23 = scalar_lea.hbm %s1077_s5, 1024 }
  0x22   : > { %p849_p6 = scmp.ne.s32.totalorder %s1077_s5, %s848_s23  ;;  %p855_p8 = scmp.lt.u32.totalorder %s848_s23, %s1077_s5 }
  0x24   : > { %p851_p2 = pnand %p849_p6, %p822_p7 }
  0x26   : > { %p852_p3 = pneg %p851_p2 }
  0x28   : > { %p857_p9 = pnand %p855_p8, %p852_p3 }
  0x2a   : > { %860 = shalt.err (!%p857_p9)
}
  0x2b   : > { %s861_s27 = scalar_lea.vmem %s965_s30, 1024  ;;  %p869_p13 = scmp.lt.s32.totalorder %s965_s30, %s965_s30 }
  0x2c   : > { %p862_p10 = scmp.ne.s32.totalorder %s965_s30, %s861_s27  ;;  %p870_p0 = scmp.lt.s32.totalorder %s861_s27, %s861_s27 }
  0x2e   : > { %p864_p11 = pnand %p862_p10, %p822_p7  ;;  %p871_p1 = por %p870_p0, %p869_p13 }
  0x30   : > { %p865_p12 = pneg %p864_p11 }
  0x32   : > { %p872_p4 = pnand %p871_p1, %p865_p12 }
  0x34   : > { %875 = shalt.err (!%p872_p4)
}
  0x35   : > { %772 = dma.hbm_to_vmem [thread:$0]  (!%p961_p5), %s1077_s5, 1024, %s965_s30, [#allocation5], %s894_s17, %s894_s17, %s895_s18  }
  0x36   : > { %p1084_p6 = scmp.ne.s32.totalorder %s1082_s28, 0 }
  0x37   : > { %p1085_p2 = scmp.eq.s32.totalorder (!%p1084_p6), %s948_s25, 0 }
  0x38   : > { %262 = sbr.rel (%p1084_p6) target bundleno = 967 (0x3c7), region = 48 }
  0x3f   : > { %881 = dma.done.wait (%p1085_p2), [#allocation3], 1024   ;;  %p1086_p7 = pmov %p1085_p2 }
  0x40   : > { %p1087_p3 = pmov %p1085_p2 }
  0x41   : > { %883 = vsyncadd (%p1086_p7), [#allocation3], 4294966272 }
  0x42   : > { %885 = dma.done.wait (%p1087_p3), [#allocation5], 1024   ;;  %p1088_p8 = pmov %p1085_p2 }
  0x43   : > { %p296_p9 = scmp.lt.s32.totalorder %s948_s25, 2  ;;  %v896_v0 = vmov 0   ;;  %v897_v1 = vmov 2   ;;  %v898_v2 = vmov 0.0   ;;  %v800_v4 = vld [vmem:[#allocation2] sm:$0xff]   ;;  %v801_v5 = vld [vmem:[#allocation2 + $0x8] sm:$0xff]   ;;  %v312_v20 = vlaneseq }
  0x44   : > { %887 = vsyncadd (%p1088_p8), [#allocation5], 4294966272  ;;  %795 = vset.pattern.permute.xlu0 %v896_v0  ;;  %797 = vset.pattern.permute.xlu1 %v897_v1  ;;  %v899_v6 = vmov 1   ;;  %v900_v7 = vmov 3   ;;  %v802_v8 = vld [vmem:[#allocation2 + $0x10] sm:$0xff]   ;;  %v803_v9 = vld [vmem:[#allocation2 + $0x18] sm:$0xff]  }
  0x45   : > { %s1090_s25 = smov (!%p296_p9, %s948_s25), 2  ;;  %718 = vmatprep.subr.bf16.mxu0 %v898_v2  ;;  %738 = vmatprep.subr.bf16.mxu1 %v898_v2  ;;  %v804_v10 = vld [vmem:[#allocation2 + $0x20] sm:$0xff]   ;;  %vm901_vm0 = vmmov 0   ;;  %v805_v11 = vld [vmem:[#allocation2 + $0x28] sm:$0xff]   ;;  %v806_v14 = vld [vmem:[#allocation2 + $0x30] sm:$0xff]   ;;  %v313_v21 = vshrl.u32 %v312_v20, 7 }
  0x46   : > { %s677_s28 = sshll.u32 %s1090_s25, 3  ;;  %719 = vmatpush3.bf16.msra.mxu0 %v800_v4  ;;  %734 = vmatprep.mubr.msk.bf16.mxu0 %vm901_vm0, %v898_v2  ;;  %v808_v12 = vld [vmem:[#allocation4] sm:$0xff]   ;;  %v809_v13 = vld [vmem:[#allocation4 + $0x8] sm:$0xff]   ;;  %v810_v15 = vld [vmem:[#allocation4 + $0x10] sm:$0xff]   ;;  %vm591_vm1 = vcmask 72704  }
  0x47   : > { %s299_s13 = scalar_lea.vmem %s1072_s0, %s677_s28  ;;  %720 = vmatprep.subr.bf16.mxu0 %v898_v2  ;;  %754 = vmatprep.mubr.msk.bf16.mxu1 %vm901_vm0, %v898_v2  ;;  %v807_v16 = vld [vmem:[#allocation2 + $0x38] sm:$0xff]   ;;  %v812_v18 = vld [vmem:[#allocation4 + $0x20] sm:$0xff]   ;;  %v813_v19 = vld [vmem:[#allocation4 + $0x28] sm:$0xff]   ;;  %v314_v22 = vsub.s32 0, %v313_v21  ;;  %v323_v23 = vsub.s32 1, %v313_v21  ;;  %v333_v26 = vsub.s32 2, %v313_v21  ;;  %s303_s26 = scalar_lea.vmem %s1079_s7, %s677_s28 }
  0x48   : > { %v305_v3 = vld [vmem:[%s299_s13] sm:$0xff]  ;;  %739 = vmatpush3.bf16.msra.mxu1 %v808_v12  ;;  %v811_v17 = vld [vmem:[#allocation4 + $0x18] sm:$0xff]   ;;  %v343_v28 = vsub.s32 3, %v313_v21  ;;  %v814_v46 = vld [vmem:[#allocation4 + $0x30] sm:$0xff]  }
  0x49   : > { %309 = vperm.xlu0 %795, %v305_v3   ;;  %328 = vperm.xlu1 %797, %v305_v3   ;;  %v306_v24 = vld [vmem:[%s1073_s1] sm:$0xf]  ;;  %v815_v47 = vld [vmem:[#allocation4 + $0x38] sm:$0xff]  }
  0x4a   : > { %721 = vmatpush3.bf16.msra.mxu0 %v801_v5  ;;  %740 = vmatprep.subr.bf16.mxu1 %v898_v2  ;;  %v315_v29 = vrot.slane %v306_v24, %v314_v22  ;;  %v324_v30 = vrot.slane %v306_v24, %v323_v23  ;;  %v334_v31 = vrot.slane %v306_v24, %v333_v26  ;;  %v679_v41 = vld [vmem:[%s1074_s2] ss:$0 sm:$0xff] }
  0x4b   : > { %722 = vmatprep.subr.bf16.mxu0 %v898_v2  ;;  %v344_v32 = vrot.slane %v306_v24, %v343_v28  ;;  %v680_v48 = vld [vmem:[%s1076_s4] ss:$0 sm:$0xff] }
  0x4c   : > { %741 = vmatpush3.bf16.msra.mxu1 %v809_v13  ;;  %v689_v56 = vld [vmem:[%s1078_s6] ss:$0 sm:$0xff] }
  0x4d   : > { %796 = vset.pattern.permute.xlu0 %v899_v6  ;;  %798 = vset.pattern.permute.xlu1 %v900_v7 }
  0x4e   : > { %318 = vperm.xlu0 %796, %v305_v3   ;;  %338 = vperm.xlu1 %798, %v305_v3  }
  0x4f   : > { %723 = vmatpush3.bf16.msra.mxu0 %v802_v8  ;;  %742 = vmatprep.subr.bf16.mxu1 %v898_v2 }
  0x50   : > { %724 = vmatprep.subr.bf16.mxu0 %v898_v2  ;;  %743 = vmatpush3.bf16.msra.mxu1 %v810_v15 }
  0x51   : > { %744 = vmatprep.subr.bf16.mxu1 %v898_v2 }
  0x52   : > { %799 = vset.pattern.permute.xlu0 %v900_v7 }
  0x53   : > { %725 = vmatpush3.bf16.msra.mxu0 %v803_v9 }
  0x54   : > { %726 = vmatprep.subr.bf16.mxu0 %v898_v2  ;;  %745 = vmatpush3.bf16.msra.mxu1 %v811_v17 }
  0x55   : > { %746 = vmatprep.subr.bf16.mxu1 %v898_v2 }
  0x57   : > { %727 = vmatpush3.bf16.msra.mxu0 %v804_v10 }
  0x58   : > { %728 = vmatprep.subr.bf16.mxu0 %v898_v2  ;;  %747 = vmatpush3.bf16.msra.mxu1 %v812_v18 }
  0x59   : > { %748 = vmatprep.subr.bf16.mxu1 %v898_v2 }
  0x5b   : > { %729 = vmatpush3.bf16.msra.mxu0 %v805_v11 }
  0x5c   : > { %730 = vmatprep.subr.bf16.mxu0 %v898_v2  ;;  %749 = vmatpush3.bf16.msra.mxu1 %v813_v19 }
  0x5d   : > { %750 = vmatprep.subr.bf16.mxu1 %v898_v2 }
  0x5f   : > { %731 = vmatpush3.bf16.msra.mxu0 %v806_v14 }
  0x60   : > { %732 = vmatprep.subr.bf16.mxu0 %v898_v2  ;;  %751 = vmatpush3.bf16.msra.mxu1 %v814_v46 }
  0x61   : > { %752 = vmatprep.subr.bf16.mxu1 %v898_v2 }
  0x63   : > { %733 = vmatpush3.bf16.msra.mxu0 %v807_v16 }
  0x64   : > { %753 = vmatpush3.bf16.msra.mxu1 %v815_v47 }
  0xc8   : > { %v310_v25 = vpop.permute.xlu0 %309  ;;  %v329_v27 = vpop.permute.xlu1 %328 }
  0xc9   : > { %v316_v35 = vmul.f32 %v315_v29, %v310_v25  ;;  %v335_v37 = vmul.f32 %v334_v31, %v329_v27 }
  0xcd   : > { %v319_v33 = vpop.permute.xlu0 %318  ;;  %v339_v34 = vpop.permute.xlu1 %338 }
  0xce   : > { %v325_v36 = vmul.f32 %v324_v30, %v319_v33  ;;  %v345_v39 = vmul.f32 %v344_v32, %v339_v34 }
  0xd0   : > { %v326_v38 = vadd.f32 %v325_v36, %v316_v35 }
  0xd2   : > { %v336_v40 = vadd.f32 %v335_v37, %v326_v38 }
  0xd4   : > { %v346_v42 = vadd.f32 %v345_v39, %v336_v40 }
  0xd6   : > { %v354_v43 = vadd.f32 %v679_v41, %v346_v42 }
  0xd8   : > { %v355_v44 = vmax.f32 %v354_v43, 0.0 }
  0xda   : > { %v356_v45 = vpack.c.bf16 %v355_v44, %v355_v44 }
  0xdc   : > { %735 = vmatmul.mubr.bf16.vlgmr.msra.gmra.mrb[0].mxu0 %v356_v45 }
 0x1af   : > { %v462_v49 = vpop.f32.mrb[0].mxu0 }
 0x1b0   : > { %v463_v50 = vadd.f32 %v680_v48, %v462_v49  ;;  %v736_v51 = vpop.f32.mrb[1].mxu0 }
 0x1b1   : > { %v465_v52 = vpop.f32.mrb[2].mxu0 }
 0x1b2   : > { %v468_v53 = vmax.f32 %v463_v50, 0.0  ;;  %v737_v54 = vpop.f32.mrb[3].mxu0 }
 0x1b4   : > { %v469_v55 = vpack.c.bf16 %v468_v53, %v468_v53 }
 0x1b6   : > { %755 = vmatmul.mubr.bf16.vlgmr.msra.gmra.mrb[0].mxu1 %v469_v55 }
 0x289   : > { %v575_v57 = vpop.f32.mrb[0].mxu1 }
 0x28a   : > { %v576_v58 = vadd.f32 %v689_v56, %v575_v57  ;;  %v756_v59 = vpop.f32.mrb[1].mxu1 }
 0x28b   : > { %v578_v60 = vpop.f32.mrb[2].mxu1 }
 0x28c   : > { %581 = vmax.xlane.f32.xlu1 %v576_v58  ;;  %v757_v61 = vpop.f32.mrb[3].mxu1 }
 0x319   : > { %v582_v62 = vpop.xlane.xlu1 %581 }
 0x31a   : > { %v583_v63 = vsub.f32 %v576_v58, %v582_v62 }
 0x31c   : > { %v584_v0 = vmul.f32 1.442695, %v583_v63 }
 0x31e   : > { %816 = vpow2.f32 %v584_v0 }
 0x328   : > { %v817_v1 = vpop.eup %816 }
 0x329   : > { %586 = vadd.xlane.f32.xlu0 %v817_v1 }
 0x3b6   : > { %v587_v2 = vpop.xlane.xlu0 %586 }
 0x3b7   : > { %818 = vlog2.f32 %v587_v2 }
 0x3c1   : > { %v819_v3 = vpop.eup %818 }
 0x3c2   : > { %v589_v4 = vmul.f32 0.6931472, %v819_v3 }
 0x3c4   : > { %v590_v5 = vsub.f32 %v583_v63, %v589_v4 }
 0x3c6   : > { %592 = vst.msk [vmem:[%s303_s26] sm:$0xff] %vm591_vm1, %v590_v5 }
 0x3c7 PF: > { %s19_s24 = sadd.s32 1, %s890_s24  }
 0x3c8   : > { %p16_p5 = scmp.ge.s32.totalorder %s19_s24, 5  }
 0x3ca   :  { %18 = sbr.rel (!%p16_p5) target bundleno = 2 (0x2), region = 87 }
 0x3d1   :  { %612 = vsyncpa [#allocation3], 1 }
 0x3d2   :  { %614 = vsyncpa [#allocation3 + $0x1], 1 }
 0x3d3   :  { %615 = vsyncpa [#allocation5], 1 }

</bundles_post_ra>
